<compile_context>
chip_gen: v7x
topology: tpu7x:2x2x1
jax: 0.10.0
libtpu: 0.0.40
codegen_flags: <defaults>
</compile_context>

<pallas_src>
import functools

import jax
import jax.numpy as jnp
from jax.experimental import pallas as pl
from jax.experimental.pallas import tpu as pltpu


def _round_up(x, m):
    return (x + m - 1) // m * m


# ----------------------------------------------------------------------------- kernel
def qnet_step_kernel(obs_ref, h0_ref,
                     w1_ref, b1_ref,
                     wgf_ref, bgf_ref,
                     wgh_ref, bghn_ref,
                     wf_ref, bf_ref,
                     out_ref, h_scr, *, g):
    """One rollout step for ALL agents; grid = (batch_block, t).

    obs_ref  : (bb, A*obs_dim)   this step's observations (leading T dim squeezed)
    h0_ref   : (bb, G)           initial hidden, zero-padded to G lanes
    w1_ref   : (A*obs_dim, KF)   block-diagonal feature Linear #1           (bf16)
    b1_ref   : (1, KF)
    wgf_ref  : (KF, 3G)          fused GRU input projection [r | z | gi_n]  (bf16)
    bgf_ref  : (1, 3G)           [b_ir+b_hr | b_iz+b_hz | b_in]
    wgh_ref  : (G, 3G)           GRU hidden projection [r | z | gh_n]       (bf16)
    bghn_ref : (1, G)            b_hn (must sit inside r*(...))
    wf_ref   : (G, OUT)          [ I_{A*H} | block-diag wq | 0 ]            (bf16)
    bf_ref   : (1, OUT)
    out_ref  : (bb, OUT)         [ h'(A*H) | q(A*n_act) | 0 pad ] lane-dense slab
    h_scr    : (bb, G) f32       hidden carry across the time grid axis
    """
    t = pl.program_id(1)

    @pl.when(t == 0)
    def _():
        h_scr[...] = h0_ref[...]

    h = h_scr[...]                                   # f32 carry
    x = obs_ref[...]

    # feature Linear #1 (block-diagonal over agents) -> ReLU
    f = jnp.maximum(
        jnp.dot(x.astype(jnp.bfloat16), w1_ref[...],
                preferred_element_type=jnp.float32) + b1_ref[...],
        0.0)

    # fused GRU pre-activations (Linear #2 folded into wgf); gate groups 128-aligned
    s_f = jnp.dot(f.astype(jnp.bfloat16), wgf_ref[...],
                  preferred_element_type=jnp.float32) + bgf_ref[...]
    s_h = jnp.dot(h.astype(jnp.bfloat16), wgh_ref[...],
                  preferred_element_type=jnp.float32)

    r = jax.nn.sigmoid(s_f[:, 0 * g:1 * g] + s_h[:, 0 * g:1 * g])
    z = jax.nn.sigmoid(s_f[:, 1 * g:2 * g] + s_h[:, 1 * g:2 * g])
    n = jnp.tanh(s_f[:, 2 * g:3 * g] + r * (s_h[:, 2 * g:3 * g] + bghn_ref[...]))
    h_new = (1.0 - z) * n + z * h                    # padding lanes stay exactly 0
    h_scr[...] = h_new

    # packed final matmul: identity block passes h' through, wq block computes q
    out_ref[...] = (jnp.dot(h_new.astype(jnp.bfloat16), wf_ref[...],
                            preferred_element_type=jnp.float32) + bf_ref[...])


# ----------------------------------------------------------------------------- packing
def init_raw_params(key, A, obs_dim, H, n_act):
    """Per-agent parameters, stored pre-transposed so all layers compute x @ W."""
    ks = jax.random.split(key, 10)
    s = 0.1
    return {
        "w1":  s * jax.random.normal(ks[0], (A, obs_dim, 64), jnp.float32),
        "b1":  s * jax.random.normal(ks[1], (A, 64), jnp.float32),
        "w2":  s * jax.random.normal(ks[2], (A, 64, H), jnp.float32),
        "b2":  s * jax.random.normal(ks[3], (A, H), jnp.float32),
        "wih": s * jax.random.normal(ks[4], (A, H, 3 * H), jnp.float32),
        "bih": s * jax.random.normal(ks[5], (A, 3 * H), jnp.float32),
        "whh": s * jax.random.normal(ks[6], (A, H, 3 * H), jnp.float32),
        "bhh": s * jax.random.normal(ks[7], (A, 3 * H), jnp.float32),
        "wq":  s * jax.random.normal(ks[8], (A, H, n_act), jnp.float32),
        "bq":  s * jax.random.normal(ks[9], (A, n_act), jnp.float32),
    }


def pack_params(p, obs_dim, H, n_act):
    """One-time host-side fusion + block-diagonalization of per-agent weights."""
    A = p["w1"].shape[0]
    F1 = 64
    AH = A * H
    G = _round_up(AH, 128)                 # 128-aligned gate-group width
    KF = A * F1
    OUT = _round_up(AH + A * n_act, 128)   # packed output slab width
    hp = jax.lax.Precision.HIGHEST

    # fold feature Linear #2 into the GRU input projection
    wp = jnp.einsum("aij,ajk->aik", p["w2"], p["wih"], precision=hp)           # (A,64,3H)
    bp = jnp.einsum("aj,ajk->ak", p["b2"], p["wih"], precision=hp) + p["bih"]  # (A,3H)

    w1_bd = jnp.zeros((A * obs_dim, KF), jnp.float32)
    b1_bd = jnp.zeros((1, KF), jnp.float32)
    wgf = jnp.zeros((KF, 3 * G), jnp.float32)     # [r | z | gi_n]
    bgf = jnp.zeros((1, 3 * G), jnp.float32)      # [b_ir+b_hr | b_iz+b_hz | b_in]
    wgh = jnp.zeros((G, 3 * G), jnp.float32)      # [r | z | gh_n]
    bghn = jnp.zeros((1, G), jnp.float32)         # [b_hn]
    wf = jnp.zeros((G, OUT), jnp.float32)
    bf = jnp.zeros((1, OUT), jnp.float32)

    wf = wf.at[:AH, :AH].set(jnp.eye(AH, dtype=jnp.float32))   # h' pass-through

    for a in range(A):
        w1_bd = w1_bd.at[a * obs_dim:(a + 1) * obs_dim, a * F1:(a + 1) * F1].set(p["w1"][a])
        b1_bd = b1_bd.at[0, a * F1:(a + 1) * F1].set(p["b1"][a])

        rf = slice(a * F1, (a + 1) * F1)   # rows fed by f (feature activations)
        rh = slice(a * H, (a + 1) * H)     # rows fed by h (hidden state)
        c = a * H                          # agent column offset inside each gate group

        # r and z groups: input-side + hidden-side are summed; biases merged into bgf
        for gate in (0, 1):
            wgf = wgf.at[rf, gate * G + c: gate * G + c + H].set(wp[a][:, gate * H:(gate + 1) * H])
            wgh = wgh.at[rh, gate * G + c: gate * G + c + H].set(p["whh"][a][:, gate * H:(gate + 1) * H])
            bgf = bgf.at[0, gate * G + c: gate * G + c + H].set(
                bp[a][gate * H:(gate + 1) * H] + p["bhh"][a][gate * H:(gate + 1) * H])

        # candidate gate: input side in group 2 of wgf, hidden side in group 2 of wgh
        wgf = wgf.at[rf, 2 * G + c: 2 * G + c + H].set(wp[a][:, 2 * H:3 * H])
        bgf = bgf.at[0, 2 * G + c: 2 * G + c + H].set(bp[a][2 * H:3 * H])
        wgh = wgh.at[rh, 2 * G + c: 2 * G + c + H].set(p["whh"][a][:, 2 * H:3 * H])
        bghn = bghn.at[0, c:c + H].set(p["bhh"][a][2 * H:3 * H])

        # per-agent Q head packed right after the identity block
        wf = wf.at[rh, AH + a * n_act: AH + (a + 1) * n_act].set(p["wq"][a])
        bf = bf.at[0, AH + a * n_act: AH + (a + 1) * n_act].set(p["bq"][a])

    packed = {
        "w1": w1_bd.astype(jnp.bfloat16), "b1": b1_bd,
        "wgf": wgf.astype(jnp.bfloat16), "bgf": bgf,
        "wgh": wgh.astype(jnp.bfloat16), "bghn": bghn,
        "wf": wf.astype(jnp.bfloat16), "bf": bf,
    }
    dims = (A, obs_dim, H, n_act, G, OUT)
    return packed, dims


# ----------------------------------------------------------------------------- forward
def qnet_rollout(obs_seq, hidden0, packed, *, dims):
    """T-step rollout in ONE pallas_call (weights VMEM-resident across steps).

    obs_seq: (T, B, A, obs_dim), hidden0: (B, A, H)
    -> q_seq (T, B, A, n_act), h_seq (T, B, A, H)   (h_seq[t] = hidden after step t)
    """
    A, obs_dim, H, n_act, G, OUT = dims
    T, B = obs_seq.shape[0], obs_seq.shape[1]
    AH = A * H
    KF = A * 64
    A_obs = A * obs_dim

    # Batch tiling: one block at small B; for large batches split into 128-row blocks
    # so the "parallel" axis can be sharded across the two TensorCores on v7x.
    bb = 128 if (B % 128 == 0) else B
    nb = B // bb

    obs_flat = obs_seq.reshape(T, B, A_obs)                      # free reshape
    h0_pad = jnp.pad(hidden0.reshape(B, AH), ((0, 0), (0, G - AH)))

    kernel = functools.partial(qnet_step_kernel, g=G)
    slab = pl.pallas_call(
        kernel,
        out_shape=jax.ShapeDtypeStruct((T, B, OUT), jnp.float32),
        grid_spec=pltpu.PrefetchScalarGridSpec(
            num_scalar_prefetch=0,
            grid=(nb, T),                                        # batch blocks x time
            in_specs=[
                pl.BlockSpec((None, bb, A_obs), lambda b, t: (t, b, 0)),   # obs (per step)
                pl.BlockSpec((bb, G), lambda b, t: (b, 0)),                # h0 (per batch blk)
                # weights: constant index_map -> DMA'd once, VMEM-resident over t
                pl.BlockSpec((A_obs, KF), lambda b, t: (0, 0)),            # w1
                pl.BlockSpec((1, KF), lambda b, t: (0, 0)),                # b1
                pl.BlockSpec((KF, 3 * G), lambda b, t: (0, 0)),            # wgf
                pl.BlockSpec((1, 3 * G), lambda b, t: (0, 0)),             # bgf
                pl.BlockSpec((G, 3 * G), lambda b, t: (0, 0)),             # wgh
                pl.BlockSpec((1, G), lambda b, t: (0, 0)),                 # bghn
                pl.BlockSpec((G, OUT), lambda b, t: (0, 0)),               # wf
                pl.BlockSpec((1, OUT), lambda b, t: (0, 0)),               # bf
            ],
            out_specs=pl.BlockSpec((None, bb, OUT), lambda b, t: (t, b, 0)),
            scratch_shapes=[pltpu.VMEM((bb, G), jnp.float32)],             # hidden carry
        ),
        compiler_params=pltpu.CompilerParams(
            dimension_semantics=("parallel", "arbitrary")),
    )(obs_flat, h0_pad,
      packed["w1"], packed["b1"],
      packed["wgf"], packed["bgf"],
      packed["wgh"], packed["bghn"],
      packed["wf"], packed["bf"])

    h_seq = slab[:, :, :AH].reshape(T, B, A, H)
    q_seq = slab[:, :, AH:AH + A * n_act].reshape(T, B, A, n_act)
    return q_seq, h_seq


def qnet_forward(obs, hidden, packed, *, dims):
    """Single step — exactly the PyTorch module's forward(obs, hidden)."""
    q_seq, h_seq = qnet_rollout(obs[None], hidden, packed, dims=dims)
    return q_seq[0], h_seq[0]


# ----------------------------------------------------------------------------- reference
def qnet_step_ref(obs, hidden, p):
    """Pure-JAX per-agent reference mirroring the PyTorch module (recurrent=True)."""
    B, A, _ = obs.shape
    H = hidden.shape[-1]
    hp = jax.lax.Precision.HIGHEST
    qs, hs = [], []
    for a in range(A):
        x = obs[:, a, :]
        h = hidden[:, a, :]
        f = jnp.maximum(jnp.dot(x, p["w1"][a], precision=hp) + p["b1"][a], 0.0)
        feat = jnp.dot(f, p["w2"][a], precision=hp) + p["b2"][a]
        gi = jnp.dot(feat, p["wih"][a], precision=hp) + p["bih"][a]
        gh = jnp.dot(h, p["whh"][a], precision=hp) + p["bhh"][a]
        r = jax.nn.sigmoid(gi[:, :H] + gh[:, :H])
        z = jax.nn.sigmoid(gi[:, H:2 * H] + gh[:, H:2 * H])
        n = jnp.tanh(gi[:, 2 * H:] + r * gh[:, 2 * H:])
        hn = (1.0 - z) * n + z * h
        qs.append((jnp.dot(hn, p["wq"][a], precision=hp) + p["bq"][a])[:, None, :])
        hs.append(hn[:, None, :])
    return jnp.concatenate(qs, axis=1), jnp.concatenate(hs, axis=1)


def qnet_rollout_ref(obs_seq, hidden0, p):
    h = hidden0
    qs, hs = [], []
    for t in range(obs_seq.shape[0]):
        q, h = qnet_step_ref(obs_seq[t], h, p)
        qs.append(q[None])
        hs.append(h[None])
    return jnp.concatenate(qs, axis=0), jnp.concatenate(hs, axis=0)


# ----------------------------------------------------------------------------- main
if __name__ == "__main__":
    T, B, A, obs_dim, H, n_act = 6, 8, 3, 10, 32, 5

    key = jax.random.PRNGKey(0)
    k_obs, k_hid, k_par = jax.random.split(key, 3)
    obs_seq = jax.random.normal(k_obs, (T, B, A, obs_dim), jnp.float32)
    # non-zero hidden exercises the whh path (QNet.init_hidden would be all zeros)
    hidden0 = 0.25 * jax.random.normal(k_hid, (B, A, H), jnp.float32)

    raw = init_raw_params(k_par, A, obs_dim, H, n_act)
    packed, dims = pack_params(raw, obs_dim, H, n_act)

    rollout = jax.jit(functools.partial(qnet_rollout, dims=dims))
    fwd = jax.jit(functools.partial(qnet_forward, dims=dims))

    # --- T-step rollout (recurrence carried inside the kernel) ---
    q_seq, h_seq = rollout(obs_seq, hidden0, packed)
    jax.block_until_ready((q_seq, h_seq))
    q_ref, h_ref = qnet_rollout_ref(obs_seq, hidden0, raw)
    assert q_seq.shape == (T, B, A, n_act) and h_seq.shape == (T, B, A, H)
    # bf16 weight storage over a multi-step recurrence vs f32 HIGHEST-precision ref
    assert jnp.allclose(q_seq, q_ref, atol=2e-2), "q mismatch (rollout)"
    assert jnp.allclose(h_seq, h_ref, atol=2e-2), "hidden mismatch (rollout)"

    # --- single step with zero hidden (== QNet.init_hidden + one forward) ---
    hidden_z = jnp.zeros((B, A, H), jnp.float32)
    q0, h0 = fwd(obs_seq[0], hidden_z, packed)
    jax.block_until_ready((q0, h0))
    q0_ref, h0_ref = qnet_step_ref(obs_seq[0], hidden_z, raw)
    assert jnp.allclose(q0, q0_ref, atol=1e-2), "q mismatch (single step, zero hidden)"
    assert jnp.allclose(h0, h0_ref, atol=1e-2), "hidden mismatch (single step, zero hidden)"

    print("KERNEL_OK")
</pallas_src>

<mosaic_0001>
module attributes {stable_mosaic.version = 11 : i64} {
  func.func @qnet_step_kernel(%arg0: i32, %arg1: i32, %arg2: memref<1x8x30xf32, #tpu.memory_space<vmem>>, %arg3: memref<8x128xf32, #tpu.memory_space<vmem>>, %arg4: memref<30x192xbf16, #tpu.memory_space<vmem>>, %arg5: memref<1x192xf32, #tpu.memory_space<vmem>>, %arg6: memref<192x384xbf16, #tpu.memory_space<vmem>>, %arg7: memref<1x384xf32, #tpu.memory_space<vmem>>, %arg8: memref<128x384xbf16, #tpu.memory_space<vmem>>, %arg9: memref<1x128xf32, #tpu.memory_space<vmem>>, %arg10: memref<128x128xbf16, #tpu.memory_space<vmem>>, %arg11: memref<1x128xf32, #tpu.memory_space<vmem>>, %arg12: memref<1x8x128xf32, #tpu.memory_space<vmem>>, %arg13: memref<8x128xf32, #tpu.memory_space<vmem>>) attributes {dimension_semantics = [#tpu.dimension_semantics<parallel>, #tpu.dimension_semantics<arbitrary>], iteration_bounds = array<i64: 1, 6>, scalar_prefetch = 0 : i64, scratch_operands = 1 : i64, tpu.core_type = #tpu.core_type<tc>, window_params = [{transform_indices = @transform_0, window_bounds = array<i64: 1, 8, 30>}, {transform_indices = @transform_1, window_bounds = array<i64: 8, 128>}, {pipeline_mode = #tpu.pipeline_mode<synchronous>, transform_indices = @transform_2, window_bounds = array<i64: 30, 192>}, {pipeline_mode = #tpu.pipeline_mode<synchronous>, transform_indices = @transform_3, window_bounds = array<i64: 1, 192>}, {pipeline_mode = #tpu.pipeline_mode<synchronous>, transform_indices = @transform_4, window_bounds = array<i64: 192, 384>}, {pipeline_mode = #tpu.pipeline_mode<synchronous>, transform_indices = @transform_5, window_bounds = array<i64: 1, 384>}, {pipeline_mode = #tpu.pipeline_mode<synchronous>, transform_indices = @transform_6, window_bounds = array<i64: 128, 384>}, {pipeline_mode = #tpu.pipeline_mode<synchronous>, transform_indices = @transform_7, window_bounds = array<i64: 1, 128>}, {pipeline_mode = #tpu.pipeline_mode<synchronous>, transform_indices = @transform_8, window_bounds = array<i64: 128, 128>}, {pipeline_mode = #tpu.pipeline_mode<synchronous>, transform_indices = @transform_9, window_bounds = array<i64: 1, 128>}, {transform_indices = @transform_10, window_bounds = array<i64: 1, 8, 128>}]} {
    %c0_i32 = arith.constant 0 : i32
    %0 = arith.cmpi eq, %arg1, %c0_i32 : i32
    %1 = arith.extui %0 : i1 to i32
    %c0_i32_0 = arith.constant 0 : i32
    %2 = arith.cmpi ne, %1, %c0_i32_0 : i32
    scf.if %2 {
      %c0_33 = arith.constant 0 : index
      %c0_34 = arith.constant 0 : index
      %62 = vector.load %arg3[%c0_33, %c0_34] : memref<8x128xf32, #tpu.memory_space<vmem>>, vector<8x128xf32>
      %c0_35 = arith.constant 0 : index
      %c0_36 = arith.constant 0 : index
      %63 = vector.load %arg13[%c0_35, %c0_36] : memref<8x128xf32, #tpu.memory_space<vmem>>, vector<8x128xf32>
      tpu.vector_store %arg13[%c0_35, %c0_36], %62 {strides = array<i32>} : memref<8x128xf32, #tpu.memory_space<vmem>>, vector<8x128xf32>,
    } else {
    }
    %c0 = arith.constant 0 : index
    %c0_1 = arith.constant 0 : index
    %3 = vector.load %arg13[%c0, %c0_1] : memref<8x128xf32, #tpu.memory_space<vmem>>, vector<8x128xf32>
    %c0_2 = arith.constant 0 : index
    %c0_3 = arith.constant 0 : index
    %c0_4 = arith.constant 0 : index
    %4 = vector.load %arg2[%c0_2, %c0_3, %c0_4] : memref<1x8x30xf32, #tpu.memory_space<vmem>>, vector<1x8x30xf32>
    %5 = vector.shape_cast %4 : vector<1x8x30xf32> to vector<8x30xf32>
    %6 = arith.truncf %5 : vector<8x30xf32> to vector<8x30xbf16>
    %c0_5 = arith.constant 0 : index
    %c0_6 = arith.constant 0 : index
    %7 = vector.load %arg4[%c0_5, %c0_6] : memref<30x192xbf16, #tpu.memory_space<vmem>>, vector<30x192xbf16>
    %cst = arith.constant dense<0.000000e+00> : vector<8x192xf32>
    %8 = tpu.matmul %6, %7, %cst {dimension_numbers = #tpu.dot_dimension_numbers<[1], [0], [0], [1], [0, 0, 1, 1], [], []>} : vector<8x30xbf16>, vector<30x192xbf16>, vector<8x192xf32> -> vector<8x192xf32>
    %c0_7 = arith.constant 0 : index
    %c0_8 = arith.constant 0 : index
    %9 = vector.load %arg5[%c0_7, %c0_8] : memref<1x192xf32, #tpu.memory_space<vmem>>, vector<1x192xf32>
    %10 = vector.broadcast %9 : vector<1x192xf32> to vector<8x192xf32>
    %11 = arith.addf %8, %10 : vector<8x192xf32>
    %cst_9 = arith.constant 0.000000e+00 : f32
    %12 = vector.broadcast %cst_9 : f32 to vector<8x192xf32>
    %13 = arith.maximumf %11, %12 : vector<8x192xf32>
    %14 = arith.truncf %13 : vector<8x192xf32> to vector<8x192xbf16>
    %c0_10 = arith.constant 0 : index
    %c0_11 = arith.constant 0 : index
    %15 = vector.load %arg6[%c0_10, %c0_11] : memref<192x384xbf16, #tpu.memory_space<vmem>>, vector<192x384xbf16>
    %cst_12 = arith.constant dense<0.000000e+00> : vector<8x384xf32>
    %16 = tpu.matmul %14, %15, %cst_12 {dimension_numbers = #tpu.dot_dimension_numbers<[1], [0], [0], [1], [0, 0, 1, 1], [], []>} : vector<8x192xbf16>, vector<192x384xbf16>, vector<8x384xf32> -> vector<8x384xf32>
    %c0_13 = arith.constant 0 : index
    %c0_14 = arith.constant 0 : index
    %17 = vector.load %arg7[%c0_13, %c0_14] : memref<1x384xf32, #tpu.memory_space<vmem>>, vector<1x384xf32>
    %18 = vector.broadcast %17 : vector<1x384xf32> to vector<8x384xf32>
    %19 = arith.addf %16, %18 : vector<8x384xf32>
    %20 = arith.truncf %3 : vector<8x128xf32> to vector<8x128xbf16>
    %c0_15 = arith.constant 0 : index
    %c0_16 = arith.constant 0 : index
    %21 = vector.load %arg8[%c0_15, %c0_16] : memref<128x384xbf16, #tpu.memory_space<vmem>>, vector<128x384xbf16>
    %cst_17 = arith.constant dense<0.000000e+00> : vector<8x384xf32>
    %22 = tpu.matmul %20, %21, %cst_17 {dimension_numbers = #tpu.dot_dimension_numbers<[1], [0], [0], [1], [0, 0, 1, 1], [], []>} : vector<8x128xbf16>, vector<128x384xbf16>, vector<8x384xf32> -> vector<8x384xf32>
    %23 = vector.extract_strided_slice %19 {offsets = [0, 0], sizes = [8, 128], strides = [1, 1]} : vector<8x384xf32> to vector<8x128xf32>
    %24 = vector.extract_strided_slice %22 {offsets = [0, 0], sizes = [8, 128], strides = [1, 1]} : vector<8x384xf32> to vector<8x128xf32>
    %25 = arith.addf %23, %24 : vector<8x128xf32>
    %26 = arith.negf %25 : vector<8x128xf32>
    %27 = math.exp %26 : vector<8x128xf32>
    %cst_18 = arith.constant 1.000000e+00 : f32
    %28 = vector.broadcast %cst_18 : f32 to vector<8x128xf32>
    %29 = arith.addf %28, %27 : vector<8x128xf32>
    %30 = arith.divf %28, %29 : vector<8x128xf32>
    %31 = vector.extract_strided_slice %19 {offsets = [0, 128], sizes = [8, 128], strides = [1, 1]} : vector<8x384xf32> to vector<8x128xf32>
    %32 = vector.extract_strided_slice %22 {offsets = [0, 128], sizes = [8, 128], strides = [1, 1]} : vector<8x384xf32> to vector<8x128xf32>
    %33 = arith.addf %31, %32 : vector<8x128xf32>
    %34 = arith.negf %33 : vector<8x128xf32>
    %35 = math.exp %34 : vector<8x128xf32>
    %cst_19 = arith.constant 1.000000e+00 : f32
    %36 = vector.broadcast %cst_19 : f32 to vector<8x128xf32>
    %37 = arith.addf %36, %35 : vector<8x128xf32>
    %38 = arith.divf %36, %37 : vector<8x128xf32>
    %39 = vector.extract_strided_slice %19 {offsets = [0, 256], sizes = [8, 128], strides = [1, 1]} : vector<8x384xf32> to vector<8x128xf32>
    %40 = vector.extract_strided_slice %22 {offsets = [0, 256], sizes = [8, 128], strides = [1, 1]} : vector<8x384xf32> to vector<8x128xf32>
    %c0_20 = arith.constant 0 : index
    %c0_21 = arith.constant 0 : index
    %41 = vector.load %arg9[%c0_20, %c0_21] : memref<1x128xf32, #tpu.memory_space<vmem>>, vector<1x128xf32>
    %42 = vector.broadcast %41 : vector<1x128xf32> to vector<8x128xf32>
    %43 = arith.addf %40, %42 : vector<8x128xf32>
    %44 = arith.mulf %30, %43 : vector<8x128xf32>
    %45 = arith.addf %39, %44 : vector<8x128xf32>
    %46 = math.tanh %45 : vector<8x128xf32>
    %cst_22 = arith.constant 1.000000e+00 : f32
    %47 = vector.broadcast %cst_22 : f32 to vector<8x128xf32>
    %48 = arith.subf %47, %38 : vector<8x128xf32>
    %49 = arith.mulf %48, %46 : vector<8x128xf32>
    %50 = arith.mulf %38, %3 : vector<8x128xf32>
    %51 = arith.addf %49, %50 : vector<8x128xf32>
    %c0_23 = arith.constant 0 : index
    %c0_24 = arith.constant 0 : index
    %52 = vector.load %arg13[%c0_23, %c0_24] : memref<8x128xf32, #tpu.memory_space<vmem>>, vector<8x128xf32>
    tpu.vector_store %arg13[%c0_23, %c0_24], %51 {strides = array<i32>} : memref<8x128xf32, #tpu.memory_space<vmem>>, vector<8x128xf32>,
    %53 = arith.truncf %51 : vector<8x128xf32> to vector<8x128xbf16>
    %c0_25 = arith.constant 0 : index
    %c0_26 = arith.constant 0 : index
    %54 = vector.load %arg10[%c0_25, %c0_26] : memref<128x128xbf16, #tpu.memory_space<vmem>>, vector<128x128xbf16>
    %cst_27 = arith.constant dense<0.000000e+00> : vector<8x128xf32>
    %55 = tpu.matmul %53, %54, %cst_27 {dimension_numbers = #tpu.dot_dimension_numbers<[1], [0], [0], [1], [0, 0, 1, 1], [], []>} : vector<8x128xbf16>, vector<128x128xbf16>, vector<8x128xf32> -> vector<8x128xf32>
    %c0_28 = arith.constant 0 : index
    %c0_29 = arith.constant 0 : index
    %56 = vector.load %arg11[%c0_28, %c0_29] : memref<1x128xf32, #tpu.memory_space<vmem>>, vector<1x128xf32>
    %57 = vector.broadcast %56 : vector<1x128xf32> to vector<8x128xf32>
    %58 = arith.addf %55, %57 : vector<8x128xf32>
    %c0_30 = arith.constant 0 : index
    %c0_31 = arith.constant 0 : index
    %c0_32 = arith.constant 0 : index
    %59 = vector.load %arg12[%c0_30, %c0_31, %c0_32] : memref<1x8x128xf32, #tpu.memory_space<vmem>>, vector<1x8x128xf32>
    %60 = vector.shape_cast %59 : vector<1x8x128xf32> to vector<8x128xf32>
    %61 = vector.shape_cast %58 : vector<8x128xf32> to vector<1x8x128xf32>
    tpu.vector_store %arg12[%c0_30, %c0_31, %c0_32], %61 {strides = array<i32>} : memref<1x8x128xf32, #tpu.memory_space<vmem>>, vector<1x8x128xf32>,
    return
  }
  func.func @transform_0(%arg0: i32, %arg1: i32) -> (i32, i32, i32) {
    %c0_i32 = arith.constant 0 : i32
    %c0_i32_0 = arith.constant 0 : i32
    return %arg1, %arg0, %c0_i32 : i32, i32, i32
  }
  func.func @transform_1(%arg0: i32, %arg1: i32) -> (i32, i32) {
    %c0_i32 = arith.constant 0 : i32
    %c0_i32_0 = arith.constant 0 : i32
    return %arg0, %c0_i32 : i32, i32
  }
  func.func @transform_2(%arg0: i32, %arg1: i32) -> (i32, i32) {
    %c0_i32 = arith.constant 0 : i32
    %c0_i32_0 = arith.constant 0 : i32
    %c0_i32_1 = arith.constant 0 : i32
    return %c0_i32, %c0_i32_0 : i32, i32
  }
  func.func @transform_3(%arg0: i32, %arg1: i32) -> (i32, i32) {
    %c0_i32 = arith.constant 0 : i32
    %c0_i32_0 = arith.constant 0 : i32
    %c0_i32_1 = arith.constant 0 : i32
    return %c0_i32, %c0_i32_0 : i32, i32
  }
  func.func @transform_4(%arg0: i32, %arg1: i32) -> (i32, i32) {
    %c0_i32 = arith.constant 0 : i32
    %c0_i32_0 = arith.constant 0 : i32
    %c0_i32_1 = arith.constant 0 : i32
    return %c0_i32, %c0_i32_0 : i32, i32
  }
  func.func @transform_5(%arg0: i32, %arg1: i32) -> (i32, i32) {
    %c0_i32 = arith.constant 0 : i32
    %c0_i32_0 = arith.constant 0 : i32
    %c0_i32_1 = arith.constant 0 : i32
    return %c0_i32, %c0_i32_0 : i32, i32
  }
  func.func @transform_6(%arg0: i32, %arg1: i32) -> (i32, i32) {
    %c0_i32 = arith.constant 0 : i32
    %c0_i32_0 = arith.constant 0 : i32
    %c0_i32_1 = arith.constant 0 : i32
    return %c0_i32, %c0_i32_0 : i32, i32
  }
  func.func @transform_7(%arg0: i32, %arg1: i32) -> (i32, i32) {
    %c0_i32 = arith.constant 0 : i32
    %c0_i32_0 = arith.constant 0 : i32
    %c0_i32_1 = arith.constant 0 : i32
    return %c0_i32, %c0_i32_0 : i32, i32
  }
  func.func @transform_8(%arg0: i32, %arg1: i32) -> (i32, i32) {
    %c0_i32 = arith.constant 0 : i32
    %c0_i32_0 = arith.constant 0 : i32
    %c0_i32_1 = arith.constant 0 : i32
    return %c0_i32, %c0_i32_0 : i32, i32
  }
  func.func @transform_9(%arg0: i32, %arg1: i32) -> (i32, i32) {
    %c0_i32 = arith.constant 0 : i32
    %c0_i32_0 = arith.constant 0 : i32
    %c0_i32_1 = arith.constant 0 : i32
    return %c0_i32, %c0_i32_0 : i32, i32
  }
  func.func @transform_10(%arg0: i32, %arg1: i32) -> (i32, i32, i32) {
    %c0_i32 = arith.constant 0 : i32
    %c0_i32_0 = arith.constant 0 : i32
    return %arg1, %arg0, %c0_i32 : i32, i32, i32
  }
}

</mosaic_0001>

<bundles_post_ra>
// kernel: qnet_rollout.1
= control target key start
LH: loop header
LB: loop body
LE: loop exit
PB: predicated region body
PF: predicated region fallthrough
CT: control target
= control target key end

     0   :  { %s1688_s13 = smov 0   ;;  %s1690_s14 = smov 0   ;;  %s2007_s0 = inlined_call_operand.vmem [shape: f32[6,8,30], index: 0, kind: input, shape index: {}]   ;;  %s2008_s1 = inlined_call_operand.vmem [shape: f32[8,128], index: 1, kind: input, shape index: {}]   ;;  %s2009_s2 = inlined_call_operand.vmem [shape: bf16[30,192], index: 2, kind: input, shape index: {}]   ;;  %s2010_s3 = inlined_call_operand.vmem [shape: f32[1,192], index: 3, kind: input, shape index: {}]   ;;  %s2011_s4 = inlined_call_operand.vmem [shape: bf16[192,384], index: 4, kind: input, shape index: {}]   ;;  %s2012_s5 = inlined_call_operand.vmem [shape: f32[1,384], index: 5, kind: input, shape index: {}]   ;;  %s2013_s6 = inlined_call_operand.vmem [shape: bf16[128,384], index: 6, kind: input, shape index: {}]   ;;  %s2014_s7 = inlined_call_operand.vmem [shape: f32[1,128], index: 7, kind: input, shape index: {}]   ;;  %s2015_s8 = inlined_call_operand.vmem [shape: bf16[128,128], index: 8, kind: input, shape index: {}]   ;;  %s2016_s9 = inlined_call_operand.vmem [shape: f32[1,128], index: 9, kind: input, shape index: {}]   ;;  %s2017_s10 = inlined_call_operand.vmem [shape: f32[6,8,128], index: 10, kind: output, shape index: {}]  }
   0x1   :  { %s1692_s15 = smov 0  }
   0x2 LB: > { %s29_s16 = sadd.s32 1, %s1624_s14  ;;  %p1325_p0 = scmp.ge.s32.totalorder %s1628_s15, 1  ;;  %s1628_s15 = sphi %s1692_s15, %s20_s15   ;;  %s1624_s14 = sphi %s1690_s14, %s2019_s14   ;;  %s1620_s13 = sphi %s1688_s13, %s2018_s13  }
   0x3   : > { %p30_p1 = scmp.ge.s32.totalorder %s29_s16, 6  ;;  %p339_p2 = scmp.lt.s32.totalorder %s1628_s15, 7 }
   0x5   : > { %s2021_s16 = smov (%p30_p1, %s29_s16), 0  ;;  %p340_p3 = pnand %p1325_p0, %p339_p2 }
   0x6   : > { %p385_p4 = scmp.lt.s32.totalorder (!%p340_p3), %s1620_s13, 5  ;;  %p1328_p5 = scmp.ne.s32.totalorder (!%p340_p3), %s1620_s13, 0 }
   0x7   : > { %343 = sbr.rel (%p340_p3) target bundleno = 759 (0x2f7), region = 60 }
   0xe   : > { %s386_s17 = scalar_select %p385_p4, %s1620_s13, 5 }
   0xf   : > { %407 = sbr.rel (%p1328_p5) target bundleno = 22 (0x16), region = 64  ;;  %v408_v0 = vld [vmem:[%s2008_s1] sm:$0xff] (!%p1328_p5) }
  0x10   : > { %s1326_s18 = sshll.u32 %s386_s17, 3  ;;  %409 = vst [vmem:[#allocation2] sm:$0xff] (!%p1328_p5), %v408_v0 }
  0x11   : > { %s391_s21 = scalar_lea.vmem %s2007_s0, %s1326_s18  ;;  %s1712_s24 = scalar_lea.vmem %s2017_s10, %s1326_s18 }
  0x16 PF: > { %v1502_v1 = vld [vmem:[%s2009_s2 + $0x4] ss:$8 sps:$4 sm:$0xff]   ;;  %v1504_v2 = vld [vmem:[%s2009_s2] ss:$8 sps:$4 sm:$0xff]   ;;  %vm451_vm0 = vcmask 1046528   ;;  %v1630_v3 = vmov 0   ;;  %v419_v47 = vlaneseq }
  0x17   : > { %490 = vmatprep.mubr.bf16.mxu0 %v1630_v3  ;;  %458 = vmatprep.subr.bf16.mxu0 %v1502_v1  ;;  %v1505_v4 = vld [vmem:[%s2009_s2 + $0x14] ss:$8 sps:$4 sm:$0x7f]   ;;  %v1507_v5 = vld [vmem:[%s2009_s2 + $0x10] ss:$8 sps:$4 sm:$0x7f]  }
  0x18   : > { %459 = vmatpush1.bf16.msra.mxu0 %v1504_v2  ;;  %v411_v6 = vld [vmem:[%s391_s21] sm:$0xff]  ;;  %v453_v7 = vsel %vm451_vm0, %v1507_v5, 0  ;;  %vm447_vm1 = vcmask 244736   ;;  %v1511_v11 = vld [vmem:[%s2011_s4 + $0x8] ss:$12 sps:$4 sm:$0xff]   ;;  %v1631_v46 = vmov 0.0  }
  0x19   : > { %1333 = vmatprep.subr.msk.bf16.mxu0 %vm451_vm0, %v1505_v4  ;;  %v1508_v8 = vld [vmem:[%s2011_s4 + $0x4] ss:$12 sps:$4 sm:$0xff]   ;;  %v1510_v9 = vld [vmem:[%s2011_s4] ss:$12 sps:$4 sm:$0xff]   ;;  %v412_v10 = vpack.c.bf16 %v411_v6, %v411_v6  ;;  %v1512_v12 = vld [vmem:[%s2011_s4 + $0x1c] ss:$12 sps:$4 sm:$0xff]  }
  0x1a   : > { %764 = vmatprep.subr.bf16.mxu1 %v1508_v8  ;;  %v1514_v13 = vld [vmem:[%s2011_s4 + $0x18] ss:$12 sps:$4 sm:$0xff]   ;;  %v1516_v14 = vld [vmem:[%s2011_s4 + $0x34] ss:$12 sps:$4 sm:$0xff]   ;;  %v1518_v16 = vld [vmem:[%s2011_s4 + $0x30] ss:$12 sps:$4 sm:$0xff]  }
  0x1b   : > { %765 = vmatpush1.bf16.msra.mxu1 %v1510_v9  ;;  %v1515_v15 = vld [vmem:[%s2011_s4 + $0x20] ss:$12 sps:$4 sm:$0xff]   ;;  %v1519_v18 = vld [vmem:[%s2011_s4 + $0x38] ss:$12 sps:$4 sm:$0xff]   ;;  %v1522_v19 = vld [vmem:[%s2011_s4 + $0x48] ss:$12 sps:$4 sm:$0xff]  }
  0x1c   : > { %461 = vmatpush1.bf16.msra.mxu0 %v453_v7  ;;  %766 = vmatprep.subr.bf16.mxu1 %v1512_v12  ;;  %v1520_v17 = vld [vmem:[%s2011_s4 + $0x4c] ss:$12 sps:$4 sm:$0xff]   ;;  %v1524_v20 = vld [vmem:[%s2011_s4 + $0x64] ss:$12 sps:$4 sm:$0xff]   ;;  %v1528_v23 = vld [vmem:[%s2011_s4 + $0x7c] ss:$12 sps:$4 sm:$0xff]  }
  0x1d   : > { %805 = vmatprep.subr.bf16.mxu0 %v1630_v3  ;;  %v1523_v21 = vld [vmem:[%s2011_s4 + $0x50] ss:$12 sps:$4 sm:$0xff]   ;;  %v1526_v22 = vld [vmem:[%s2011_s4 + $0x60] ss:$12 sps:$4 sm:$0xff]   ;;  %v1527_v24 = vld [vmem:[%s2011_s4 + $0x68] ss:$12 sps:$4 sm:$0xff]  }
  0x1e   : > { %v1530_v25 = vld [vmem:[%s2011_s4 + $0x78] ss:$12 sps:$4 sm:$0xff]   ;;  %v1532_v26 = vld [vmem:[%s2011_s4 + $0x94] ss:$12 sps:$4 sm:$0xff]   ;;  %v1534_v28 = vld [vmem:[%s2011_s4 + $0x90] ss:$12 sps:$4 sm:$0xff]  }
  0x1f   : > { %1334 = vmatmul.mubr.msk.bf16.vlgmr.msra.gmra.mrb[0].mxu0 %vm447_vm1, %v412_v10  ;;  %767 = vmatpush1.bf16.msra.mxu1 %v1514_v13  ;;  %v1531_v27 = vld [vmem:[%s2011_s4 + $0x80] ss:$12 sps:$4 sm:$0xff]   ;;  %v1535_v30 = vld [vmem:[%s2011_s4 + $0x98] ss:$12 sps:$4 sm:$0xff]   ;;  %v1538_v31 = vld [vmem:[%s2011_s4 + $0xa8] ss:$12 sps:$4 sm:$0xff]  }
  0x20   : > { %806 = vmatpush1.bf16.msra.mxu0 %v1511_v11  ;;  %768 = vmatprep.subr.bf16.mxu1 %v1516_v14  ;;  %v1536_v29 = vld [vmem:[%s2011_s4 + $0xac] ss:$12 sps:$4 sm:$0xff]   ;;  %v1540_v32 = vld [vmem:[%s2011_s4 + $0xc4] ss:$12 sps:$4 sm:$0xff]   ;;  %v1544_v35 = vld [vmem:[%s2011_s4 + $0xdc] ss:$12 sps:$4 sm:$0xff]  }
  0x21   : > { %807 = vmatprep.subr.bf16.mxu0 %v1630_v3  ;;  %v1539_v33 = vld [vmem:[%s2011_s4 + $0xb0] ss:$12 sps:$4 sm:$0xff]   ;;  %v1542_v34 = vld [vmem:[%s2011_s4 + $0xc0] ss:$12 sps:$4 sm:$0xff]   ;;  %v1543_v36 = vld [vmem:[%s2011_s4 + $0xc8] ss:$12 sps:$4 sm:$0xff]  }
  0x22   : > { %v1546_v37 = vld [vmem:[%s2011_s4 + $0xd8] ss:$12 sps:$4 sm:$0xff]   ;;  %v1547_v38 = vld [vmem:[%s2011_s4 + $0xe0] ss:$12 sps:$4 sm:$0xff]   ;;  %v1550_v40 = vld [vmem:[%s2011_s4 + $0xf0] ss:$12 sps:$4 sm:$0xff]  }
  0x23   : > { %769 = vmatpush1.bf16.msra.mxu1 %v1518_v16  ;;  %v1548_v39 = vld [vmem:[%s2011_s4 + $0xf4] ss:$12 sps:$4 sm:$0xff]   ;;  %v1551_v41 = vld [vmem:[%s2011_s4 + $0xf8] ss:$12 sps:$4 sm:$0xff]   ;;  %v1555_v44 = vld [vmem:[%s2011_s4 + $0x110] ss:$12 sps:$4 sm:$0xff]  }
  0x24   : > { %808 = vmatpush1.bf16.msra.mxu0 %v1515_v15  ;;  %770 = vmatprep.subr.bf16.mxu1 %v1520_v17  ;;  %v1552_v42 = vld [vmem:[%s2011_s4 + $0x10c] ss:$12 sps:$4 sm:$0xff]   ;;  %v1554_v43 = vld [vmem:[%s2011_s4 + $0x108] ss:$12 sps:$4 sm:$0xff]   ;;  %v1558_v45 = vld [vmem:[%s2013_s6 + $0x4] ss:$12 sps:$4 sm:$0xff]  }
  0x25   : > { %809 = vmatprep.subr.bf16.mxu0 %v1630_v3  ;;  %v1854_v48 = vshrl.u32 %v419_v47, 7  ;;  %v417_v50 = vld [vmem:[%s2010_s3] sm:$0x3]  ;;  %vm760_vm2 = vcmask 523264   ;;  %v1577_v0 = vld [vmem:[%s2013_s6 + $0x8] ss:$12 sps:$4 sm:$0xff]  }
  0x26   : > { %v1556_v63 = vld [vmem:[%s2013_s6] ss:$12 sps:$4 sm:$0xff]   ;;  %v1561_v2 = vld [vmem:[%s2013_s6 + $0x1c] ss:$12 sps:$4 sm:$0xff]   ;;  %v1559_v4 = vld [vmem:[%s2013_s6 + $0x18] ss:$12 sps:$4 sm:$0xff]  }
  0x27   : > { %771 = vmatpush1.bf16.msra.mxu1 %v1522_v19  ;;  %v421_v49 = vsub.s32 0, %v1854_v48  ;;  %v425_v51 = vsub.s32 1, %v1854_v48  ;;  %v1581_v5 = vld [vmem:[%s2013_s6 + $0x20] ss:$12 sps:$4 sm:$0xff]   ;;  %vm1632_vm3 = vmmov 0  }
  0x28   : > { %810 = vmatpush1.bf16.msra.mxu0 %v1519_v18  ;;  %772 = vmatprep.subr.bf16.mxu1 %v1524_v20  ;;  %v1564_v6 = vld [vmem:[%s2013_s6 + $0x34] ss:$12 sps:$4 sm:$0xff]   ;;  %v1562_v7 = vld [vmem:[%s2013_s6 + $0x30] ss:$12 sps:$4 sm:$0xff]   ;;  %v1582_v8 = vld [vmem:[%s2013_s6 + $0x38] ss:$12 sps:$4 sm:$0xff]  }
  0x29   : > { %811 = vmatprep.subr.bf16.mxu0 %v1630_v3  ;;  %v422_v52 = vrot.slane %v417_v50, %v421_v49  ;;  %v426_v53 = vrot.slane %v417_v50, %v425_v51  ;;  %v1567_v9 = vld [vmem:[%s2013_s6 + $0x4c] ss:$12 sps:$4 sm:$0xff]   ;;  %v1583_v10 = vld [vmem:[%s2013_s6 + $0x50] ss:$12 sps:$4 sm:$0xff]   ;;  %v1584_v13 = vld [vmem:[%s2013_s6 + $0x68] ss:$12 sps:$4 sm:$0xff]  }
  0x2a   : > { %v1570_v11 = vld [vmem:[%s2013_s6 + $0x64] ss:$12 sps:$4 sm:$0xff]   ;;  %v1568_v12 = vld [vmem:[%s2013_s6 + $0x60] ss:$12 sps:$4 sm:$0xff]   ;;  %v1573_v14 = vld [vmem:[%s2013_s6 + $0x7c] ss:$12 sps:$4 sm:$0xff]  }
  0x2b   : > { %773 = vmatpush1.bf16.msra.mxu1 %v1526_v22  ;;  %v1571_v15 = vld [vmem:[%s2013_s6 + $0x78] ss:$12 sps:$4 sm:$0xff]   ;;  %v1585_v16 = vld [vmem:[%s2013_s6 + $0x80] ss:$12 sps:$4 sm:$0xff]   ;;  %v1574_v18 = vld [vmem:[%s2013_s6 + $0x90] ss:$12 sps:$4 sm:$0xff]  }
  0x2c   : > { %812 = vmatpush1.bf16.msra.mxu0 %v1523_v21  ;;  %774 = vmatprep.subr.bf16.mxu1 %v1528_v23  ;;  %v1576_v17 = vld [vmem:[%s2013_s6 + $0x94] ss:$12 sps:$4 sm:$0xff]   ;;  %v1586_v19 = vld [vmem:[%s2013_s6 + $0x98] ss:$12 sps:$4 sm:$0xff]   ;;  %v1587_v23 = vld [vmem:[%s2013_s6 + $0xb0] ss:$12 sps:$4 sm:$0xff]  }
  0x2d   : > { %813 = vmatprep.subr.bf16.mxu0 %v1630_v3  ;;  %v1580_v20 = vld [vmem:[%s2013_s6 + $0xac] ss:$12 sps:$4 sm:$0xff]   ;;  %v1578_v21 = vld [vmem:[%s2013_s6 + $0xa8] ss:$12 sps:$4 sm:$0xff]   ;;  %v1940_v22 = vld [vmem:[#allocation2] sm:$0xff] }
  0x2f   : > { %775 = vmatpush1.bf16.msra.mxu1 %v1530_v25  ;;  %v1588_v25 = vld [vmem:[%s2015_s8] sm:$0xff]  }
  0x30   : > { %814 = vmatpush1.bf16.msra.mxu0 %v1527_v24  ;;  %776 = vmatprep.subr.bf16.mxu1 %v1532_v26  ;;  %v845_v24 = vpack.c.bf16 %v1940_v22, %v1940_v22  ;;  %v1589_v26 = vld [vmem:[%s2015_s8 + $0x8] sm:$0xff]  }
  0x31   : > { %815 = vmatprep.subr.bf16.mxu0 %v1630_v3 }
  0x33   : > { %777 = vmatpush1.bf16.msra.mxu1 %v1534_v28  ;;  %v1591_v28 = vld [vmem:[%s2015_s8 + $0x18] sm:$0xff]  }
  0x34   : > { %816 = vmatpush1.bf16.msra.mxu0 %v1531_v27  ;;  %778 = vmatprep.subr.bf16.mxu1 %v1536_v29  ;;  %v1590_v27 = vld [vmem:[%s2015_s8 + $0x10] sm:$0xff]   ;;  %v1592_v29 = vld [vmem:[%s2015_s8 + $0x20] sm:$0xff]  }
  0x35   : > { %817 = vmatprep.subr.bf16.mxu0 %v1630_v3 }
  0x37   : > { %779 = vmatpush1.bf16.msra.mxu1 %v1538_v31  ;;  %v1594_v31 = vld [vmem:[%s2015_s8 + $0x30] sm:$0xff]  }
  0x38   : > { %818 = vmatpush1.bf16.msra.mxu0 %v1535_v30  ;;  %780 = vmatprep.subr.bf16.mxu1 %v1540_v32  ;;  %v1593_v30 = vld [vmem:[%s2015_s8 + $0x28] sm:$0xff]   ;;  %v1595_v32 = vld [vmem:[%s2015_s8 + $0x38] sm:$0xff]  }
  0x39   : > { %819 = vmatprep.subr.bf16.mxu0 %v1630_v3 }
  0x3b   : > { %781 = vmatpush1.bf16.msra.mxu1 %v1542_v34 }
  0x3c   : > { %820 = vmatpush1.bf16.msra.mxu0 %v1539_v33  ;;  %782 = vmatprep.subr.bf16.mxu1 %v1544_v35 }
  0x3d   : > { %821 = vmatprep.subr.bf16.mxu0 %v1630_v3 }
  0x3f   : > { %783 = vmatpush1.bf16.msra.mxu1 %v1546_v37  ;;  %v551_v37 = vld [vmem:[%s2012_s5] sm:$0x7] }
  0x40   : > { %822 = vmatpush1.bf16.msra.mxu0 %v1543_v36  ;;  %784 = vmatprep.subr.bf16.mxu1 %v1548_v39 }
  0x41   : > { %823 = vmatprep.subr.bf16.mxu0 %v1630_v3 }
  0x43   : > { %785 = vmatpush1.bf16.msra.mxu1 %v1550_v40  ;;  %v560_v40 = vrot.slane %v551_v37, %v425_v51  ;;  %v1399_v51 = vld [vmem:[%s2014_s7] ss:$0 sm:$0xff] }
  0x44   : > { %824 = vmatpush1.bf16.msra.mxu0 %v1547_v38  ;;  %786 = vmatprep.subr.bf16.mxu1 %v1552_v42  ;;  %v556_v38 = vrot.slane %v551_v37, %v421_v49  ;;  %v563_v49 = vsub.s32 2, %v1854_v48 }
  0x45   : > { %825 = vmatprep.subr.bf16.mxu0 %v1630_v3 }
  0x47   : > { %787 = vmatpush1.bf16.msra.mxu1 %v1554_v43 }
  0x48   : > { %826 = vmatpush1.bf16.msra.mxu0 %v1551_v41  ;;  %1006 = vmatprep.subr.bf16.mxu1 %v1558_v45 }
  0x49   : > { %827 = vmatprep.subr.bf16.mxu0 %v1630_v3 }
  0x4c   : > { %828 = vmatpush1.bf16.msra.mxu0 %v1555_v44 }
  0x4d   : > { %1429 = vmatprep.subr.bf16.mxu0 %v1631_v46 }
  0xf2   : > { %v492_v54 = vpop.f32.mrb[0].mxu0 }
  0xf3   : > { %v493_v55 = vadd.f32 %v492_v54, %v422_v52  ;;  %v494_v56 = vpop.f32.mrb[1].mxu0 }
  0xf4   : > { %v495_v57 = vadd.f32 %v494_v56, %v426_v53  ;;  %v496_v58 = vpop.f32.mrb[2].mxu0 }
  0xf5   : > { %v499_v59 = vmax.f32 %v493_v55, 0.0  ;;  %v497_v60 = vpop.f32.mrb[3].mxu0  ;;  %v564_v58 = vrot.slane %v551_v37, %v563_v49 }
  0xf6   : > { %v500_v61 = vmax.f32 %v495_v57, 0.0 }
  0xf7   : > { %v501_v1 = vpack.c.bf16 %v499_v59, %v499_v59 }
  0xf8   : > { %v502_v62 = vpack.c.bf16 %v500_v61, %v500_v61 }
  0xfa   : > { %1371 = vmatprep.mubr.msk.bf16.mxu1 %vm760_vm2, %v502_v62  ;;  %1372 = vmatprep.mubr.msk.bf16.mxu0 %vm760_vm2, %v502_v62 }
  0xfb   : > { %797 = vmatmul.mubr.bf16.vlgmr.msra.gmra.mrb[0].mxu1 %v501_v1  ;;  %838 = vmatmul.mubr.bf16.vlgmr.msra.gmra.mrb[4].mxu0 %v501_v1 }
  0xfc   : > { %1007 = vmatpush1.bf16.msra.mxu1 %v1556_v63  ;;  %1430 = vmatpush3.bf16.msra.mxu0 %v1577_v0 }
  0xfd   : > { %1008 = vmatprep.subr.bf16.mxu1 %v1561_v2  ;;  %1431 = vmatprep.subr.bf16.mxu0 %v1631_v46 }
  0xfe   : > { %1038 = vmatprep.mubr.bf16.mxu1 %v1630_v3  ;;  %1445 = vmatprep.mubr.msk.bf16.mxu0 %vm1632_vm3, %v1631_v46  ;;  %v1565_v3 = vld [vmem:[%s2013_s6 + $0x48] ss:$12 sps:$4 sm:$0xff]  }
 0x100   : > { %1009 = vmatpush1.bf16.msra.mxu1 %v1559_v4  ;;  %1432 = vmatpush3.bf16.msra.mxu0 %v1581_v5 }
 0x101   : > { %1010 = vmatprep.subr.bf16.mxu1 %v1564_v6  ;;  %1433 = vmatprep.subr.bf16.mxu0 %v1631_v46 }
 0x104   : > { %1011 = vmatpush1.bf16.msra.mxu1 %v1562_v7  ;;  %1434 = vmatpush3.bf16.msra.mxu0 %v1582_v8  ;;  %v1400_v8 = vld [vmem:[%s2016_s9] ss:$0 sm:$0xff] }
 0x105   : > { %1012 = vmatprep.subr.bf16.mxu1 %v1567_v9  ;;  %1435 = vmatprep.subr.bf16.mxu0 %v1631_v46 }
 0x108   : > { %1013 = vmatpush1.bf16.msra.mxu1 %v1565_v3  ;;  %1436 = vmatpush3.bf16.msra.mxu0 %v1583_v10 }
 0x109   : > { %1014 = vmatprep.subr.bf16.mxu1 %v1570_v11  ;;  %1437 = vmatprep.subr.bf16.mxu0 %v1631_v46 }
 0x10c   : > { %1015 = vmatpush1.bf16.msra.mxu1 %v1568_v12  ;;  %1438 = vmatpush3.bf16.msra.mxu0 %v1584_v13 }
 0x10d   : > { %1016 = vmatprep.subr.bf16.mxu1 %v1573_v14  ;;  %1439 = vmatprep.subr.bf16.mxu0 %v1631_v46 }
 0x110   : > { %1017 = vmatpush1.bf16.msra.mxu1 %v1571_v15  ;;  %1440 = vmatpush3.bf16.msra.mxu0 %v1585_v16 }
 0x111   : > { %1018 = vmatprep.subr.bf16.mxu1 %v1576_v17  ;;  %1441 = vmatprep.subr.bf16.mxu0 %v1631_v46 }
 0x114   : > { %1019 = vmatpush1.bf16.msra.mxu1 %v1574_v18  ;;  %1442 = vmatpush3.bf16.msra.mxu0 %v1586_v19 }
 0x115   : > { %1020 = vmatprep.subr.bf16.mxu1 %v1580_v20  ;;  %1443 = vmatprep.subr.bf16.mxu0 %v1631_v46 }
 0x118   : > { %1021 = vmatpush1.bf16.msra.mxu1 %v1578_v21  ;;  %1444 = vmatpush3.bf16.msra.mxu0 %v1587_v23 }
 0x119   : > { %1449 = vmatprep.subr.bf16.mxu1 %v1631_v46 }
 0x11b   : > { %1039 = vmatmul.mubr.bf16.vlgmr.msra.gmra.mrb[0].mxu1 %v845_v24  ;;  %1446 = vmatmul.mubr.bf16.vlgmr.msra.gmra.mrb[8].mxu0 %v845_v24 }
 0x11c   : > { %1465 = vmatprep.mubr.msk.bf16.mxu1 %vm1632_vm3, %v1631_v46  ;;  %1450 = vmatpush3.bf16.msra.mxu1 %v1588_v25 }
 0x11d   : > { %1451 = vmatprep.subr.bf16.mxu1 %v1631_v46 }
 0x120   : > { %1452 = vmatpush3.bf16.msra.mxu1 %v1589_v26 }
 0x121   : > { %1453 = vmatprep.subr.bf16.mxu1 %v1631_v46 }
 0x124   : > { %1454 = vmatpush3.bf16.msra.mxu1 %v1590_v27 }
 0x125   : > { %1455 = vmatprep.subr.bf16.mxu1 %v1631_v46 }
 0x128   : > { %1456 = vmatpush3.bf16.msra.mxu1 %v1591_v28 }
 0x129   : > { %1457 = vmatprep.subr.bf16.mxu1 %v1631_v46 }
 0x12c   : > { %1458 = vmatpush3.bf16.msra.mxu1 %v1592_v29 }
 0x12d   : > { %1459 = vmatprep.subr.bf16.mxu1 %v1631_v46 }
 0x130   : > { %1460 = vmatpush3.bf16.msra.mxu1 %v1593_v30 }
 0x131   : > { %1461 = vmatprep.subr.bf16.mxu1 %v1631_v46 }
 0x134   : > { %1462 = vmatpush3.bf16.msra.mxu1 %v1594_v31 }
 0x135   : > { %1463 = vmatprep.subr.bf16.mxu1 %v1631_v46 }
 0x138   : > { %1464 = vmatpush3.bf16.msra.mxu1 %v1595_v32 }
 0x1ce   : > { %v839_v33 = vpop.f32.mrb[4].mxu0 }
 0x1cf   : > { %v841_v34 = vpop.f32.mrb[5].mxu0  ;;  %v840_v62 = vadd.f32 %v839_v33, %v564_v58 }
 0x1d0   : > { %v842_v35 = vpop.f32.mrb[6].mxu0 }
 0x1d1   : > { %v843_v36 = vpop.f32.mrb[7].mxu0 }
 0x1ee   : > { %v1040_v39 = vpop.f32.mrb[0].mxu1  ;;  %v1081_v41 = vpop.f32.mrb[8].mxu0 }
 0x1ef   : > { %v1469_v42 = vadd.f32 %v1040_v39, %v556_v38  ;;  %v1042_v43 = vpop.f32.mrb[1].mxu1  ;;  %v1447_v44 = vpop.f32.mrb[9].mxu0  ;;  %v1108_v60 = vadd.f32 %v1399_v51, %v1081_v41 }
 0x1f0   : > { %v1044_v45 = vpop.f32.mrb[2].mxu1  ;;  %v1084_v46 = vpop.f32.mrb[10].mxu0  ;;  %v1470_v53 = vadd.f32 %v1042_v43, %v560_v40 }
 0x1f1   : > { %v1397_v47 = vmul.f32 -1.442695, %v1469_v42  ;;  %v1045_v50 = vpop.f32.mrb[3].mxu1  ;;  %v1448_v52 = vpop.f32.mrb[11].mxu0 }
 0x1f2   : > { %v1398_v54 = vmul.f32 -1.442695, %v1470_v53 }
 0x1f3   : > { %1596 = vpow2.f32 %v1397_v47 }
 0x1f4   : > { %1598 = vpow2.f32 %v1398_v54 }
 0x1fd   : > { %v1597_v55 = vpop.eup %1596 }
 0x1fe   : > { %v1091_v56 = vadd.f32 1.0, %v1597_v55  ;;  %v1599_v57 = vpop.eup %1598 }
 0x1ff   : > { %v1098_v59 = vadd.f32 1.0, %v1599_v57 }
 0x200   : > { %1600 = vrcp.f32 %v1091_v56 }
 0x201   : > { %1602 = vrcp.f32 %v1098_v59 }
 0x20a   : > { %v1601_v61 = vpop.eup %1600 }
 0x20b   : > { %v1109_v63 = vmul.f32 %v1601_v61, %v1108_v60  ;;  %v1603_v1 = vpop.eup %1602 }
 0x20c   : > { %v1112_v2 = vsub.f32 1.0, %v1603_v1  ;;  %v1114_v48 = vmul.f32 %v1603_v1, %v1940_v22 }
 0x20d   : > { %v1110_v0 = vadd.f32 %v1109_v63, %v840_v62 }
 0x20f   : > { %1604 = vtanh.f32 %v1110_v0 }
 0x219   : > { %v1605_v4 = vpop.eup %1604 }
 0x21a   : > { %v1113_v5 = vmul.f32 %v1605_v4, %v1112_v2 }
 0x21c   : > { %v1115_v6 = vadd.f32 %v1114_v48, %v1113_v5 }
 0x21e   : > { %1116 = vst [vmem:[#allocation2] sm:$0xff] %v1115_v6  ;;  %v1117_v7 = vpack.c.bf16 %v1115_v6, %v1115_v6 }
 0x220   : > { %1466 = vmatmul.mubr.bf16.vlgmr.msra.gmra.mrb[4].mxu1 %v1117_v7 }
 0x2f3   : > { %v1223_v9 = vpop.f32.mrb[4].mxu1 }
 0x2f4   : > { %v1224_v3 = vadd.f32 %v1400_v8, %v1223_v9  ;;  %v1467_v10 = vpop.f32.mrb[5].mxu1 }
 0x2f5   : > { %v1226_v11 = vpop.f32.mrb[6].mxu1 }
 0x2f6   : > { %1229 = vst [vmem:[%s1712_s24] sm:$0xff] %v1224_v3  ;;  %v1468_v12 = vpop.f32.mrb[7].mxu1 }
 0x2f7 PF: > { %s20_s15 = sadd.s32 1, %s1628_s15   ;;  %s2018_s13 = smov %s1624_s14 }
 0x2f8   : > { %p17_p6 = scmp.ge.s32.totalorder %s20_s15, 8   ;;  %s2019_s14 = smov %s2021_s16 }
 0x2fa   :  { %19 = sbr.rel (!%p17_p6) target bundleno = 2 (0x2), region = 97 }

</bundles_post_ra>
